<compile_context>
chip_gen: v6e
topology: v6e:2x2x1
jax: 0.10.0
libtpu: 0.0.40
codegen_flags: <defaults>
</compile_context>

<pallas_src>
import jax
import jax.numpy as jnp
from jax.experimental import pallas as pl
from jax.experimental.pallas import tpu as pltpu


def attention_kernel(enc_ref, dec_ref, mask_ref, w1_ref, w2_ref, vt_ref, out_ref):
    """One batch tile of additive attention + masked log-softmax.

    enc_ref : (TB, S, H)   encoder_output tile
    dec_ref : (TB, H)      decoder_hidden tile
    mask_ref: (TB, S)      padding mask tile (1.0 = valid)
    w1_ref  : (H, H)       W1 in (in, out) layout
    w2_ref  : (H, H)       W2 in (in, out) layout
    vt_ref  : (1, H)       vt row
    out_ref : (TB, S)      masked log-softmax scores
    """
    TB, S, H = enc_ref.shape

    # W1 projection: one tall (TB*S, H) x (H, H) MXU matmul (amortizes MXU
    # pipeline fill/drain vs. TB tiny batched matmuls).
    enc2d = enc_ref[...].reshape(TB * S, H)
    enc_t = jnp.dot(enc2d, w1_ref[...], preferred_element_type=jnp.float32)
    enc_t = enc_t.reshape(TB, S, H)

    # W2 projection of the decoder state, broadcast over seq.
    dec_t = jnp.dot(dec_ref[...], w2_ref[...], preferred_element_type=jnp.float32)

    h = jnp.tanh(enc_t + dec_t[:, None, :])                     # (TB, S, H)

    # vt contraction on the VPU/XLU: an (M, H) x (H, 1) matmul would use <1%
    # of the MXU output lanes, so do mul + reduce instead.
    score = jnp.sum(h * vt_ref[...], axis=-1)                   # (TB, S)

    # Masked log-softmax over seq (finite large-negative instead of -inf:
    # cheaper (no EUP log) and NaN-safe for fully-masked rows).
    masked = jnp.where(mask_ref[...] > 0, score, jnp.float32(-1e30))
    m = jnp.max(masked, axis=-1, keepdims=True)
    e = jnp.exp(masked - m)
    lse = jnp.log(jnp.sum(e, axis=-1, keepdims=True)) + m
    out_ref[...] = masked - lse


def attention_pallas(encoder_output, decoder_hidden, mask, w1_t, w2_t, vt_row):
    """w1_t, w2_t: (H, H) already in (in_features, out_features) layout.
    vt_row: (1, H) -- PyTorch's vt.weight is already this shape (no transpose).
    """
    B, S, H = encoder_output.shape
    f32 = 4

    # Batch tile: keep the per-tile f32 slabs (enc block x 2 buffers plus the
    # enc_t / h intermediates) in the low-MiB range so it fits comfortably on
    # every generation (v7x: 64 MiB VMEM/TC) while still being large enough to
    # amortize the ~0.35 us per-step pipeline overhead.
    per_row_bytes = S * H * f32 * 6           # 2x enc buffers + enc_t + h + slack
    tb = max(1, (8 * 1024 * 1024) // max(per_row_bytes, 1))
    if tb >= B:
        tb = B                                # tiny batch: single full-batch tile
    else:
        tb = max(8, (tb // 8) * 8)            # sublane-aligned partial batch tiles
    grid = (pl.cdiv(B, tb),)

    # Explicit scoped-VMEM budget sized from the chosen tiles (defaults are
    # 16/32 MiB which can force spills for bigger tiles).
    blk = tb * S * H * f32
    est = (2 * (blk + tb * H * f32 + 2 * tb * S * f32 + 2 * H * H * f32 + H * f32)
           + 3 * blk)
    vmem_limit = int(min(48 * 1024 * 1024, max(8 * 1024 * 1024, 2 * est)))

    # TODO(synk): for very long S, pad S to a multiple of 128 wrapper-side so
    # the (TB, S) output block stores lane-dense (unmasked vst).
    return pl.pallas_call(
        attention_kernel,
        out_shape=jax.ShapeDtypeStruct((B, S), jnp.float32),
        grid=grid,
        in_specs=[
            pl.BlockSpec((tb, S, H), lambda i: (i, 0, 0)),   # encoder_output tile
            pl.BlockSpec((tb, H), lambda i: (i, 0)),         # decoder_hidden tile
            pl.BlockSpec((tb, S), lambda i: (i, 0)),         # mask tile
            pl.BlockSpec((H, H), lambda i: (0, 0)),          # W1 (resident)
            pl.BlockSpec((H, H), lambda i: (0, 0)),          # W2 (resident)
            pl.BlockSpec((1, H), lambda i: (0, 0)),          # vt row (resident)
        ],
        out_specs=pl.BlockSpec((tb, S), lambda i: (i, 0)),
        compiler_params=pltpu.CompilerParams(
            dimension_semantics=("parallel",),               # shard batch tiles across TCs
            vmem_limit_bytes=vmem_limit,
        ),
    )(encoder_output, decoder_hidden, mask, w1_t, w2_t, vt_row)


def attention_reference(encoder_output, decoder_hidden, mask, W1, W2, vt):
    enc_t = encoder_output @ W1.T
    dec_t = (decoder_hidden @ W2.T)[:, None, :]
    score = (jnp.tanh(enc_t + dec_t) @ vt.T)[..., 0]
    masked = score + jnp.log(mask + 1e-45)
    return jax.nn.log_softmax(masked, axis=-1)


if __name__ == "__main__":
    B, S, H = 2, 8, 32
    key = jax.random.PRNGKey(0)
    k_enc, k_dec, k_w1, k_w2, k_vt = jax.random.split(key, 5)

    encoder_output = jax.random.normal(k_enc, (B, S, H), dtype=jnp.float32)
    decoder_hidden = jax.random.normal(k_dec, (B, H), dtype=jnp.float32)
    # Padding mask: first batch fully valid, second batch valid for 5 tokens.
    mask = jnp.stack(
        [jnp.ones((S,), jnp.float32),
         (jnp.arange(S) < 5).astype(jnp.float32)], axis=0)

    # Deterministic parameter init matching nn.Linear shapes (out, in).
    bound = 1.0 / (H ** 0.5)
    W1 = jax.random.uniform(k_w1, (H, H), jnp.float32, -bound, bound)
    W2 = jax.random.uniform(k_w2, (H, H), jnp.float32, -bound, bound)
    vt = jax.random.uniform(k_vt, (1, H), jnp.float32, -bound, bound)

    # One-time layout prep (hoisted out of the call path): (out,in) -> (in,out).
    w1_t = jnp.asarray(W1.T)
    w2_t = jnp.asarray(W2.T)

    out = attention_pallas(encoder_output, decoder_hidden, mask, w1_t, w2_t, vt)
    out = jax.block_until_ready(out)

    ref = attention_reference(encoder_output, decoder_hidden, mask, W1, W2, vt)
    # Compare only on unmasked positions (masked positions are huge-negative).
    valid = mask > 0
    diff = jnp.max(jnp.abs(jnp.where(valid, out - ref, 0.0)))
    assert out.shape == (B, S)
    assert bool(diff < 1e-4), f"mismatch: {diff}"
    print("KERNEL_OK")
</pallas_src>

<mosaic_0001>
module attributes {stable_mosaic.version = 11 : i64} {
  func.func @attention_kernel(%arg0: i32, %arg1: memref<2x8x32xf32, #tpu.memory_space<vmem>>, %arg2: memref<2x32xf32, #tpu.memory_space<vmem>>, %arg3: memref<2x8xf32, #tpu.memory_space<vmem>>, %arg4: memref<32x32xf32, #tpu.memory_space<vmem>>, %arg5: memref<32x32xf32, #tpu.memory_space<vmem>>, %arg6: memref<1x32xf32, #tpu.memory_space<vmem>>, %arg7: memref<2x8xf32, #tpu.memory_space<vmem>>) attributes {dimension_semantics = [#tpu.dimension_semantics<parallel>], iteration_bounds = array<i64: 1>, scalar_prefetch = 0 : i64, scratch_operands = 0 : i64, tpu.core_type = #tpu.core_type<tc>, window_params = [{transform_indices = @transform_0, window_bounds = array<i64: 2, 8, 32>}, {transform_indices = @transform_1, window_bounds = array<i64: 2, 32>}, {transform_indices = @transform_2, window_bounds = array<i64: 2, 8>}, {pipeline_mode = #tpu.pipeline_mode<synchronous>, transform_indices = @transform_3, window_bounds = array<i64: 32, 32>}, {pipeline_mode = #tpu.pipeline_mode<synchronous>, transform_indices = @transform_4, window_bounds = array<i64: 32, 32>}, {pipeline_mode = #tpu.pipeline_mode<synchronous>, transform_indices = @transform_5, window_bounds = array<i64: 1, 32>}, {transform_indices = @transform_6, window_bounds = array<i64: 2, 8>}]} {
    %c0 = arith.constant 0 : index
    %c0_0 = arith.constant 0 : index
    %c0_1 = arith.constant 0 : index
    %0 = vector.load %arg1[%c0, %c0_0, %c0_1] : memref<2x8x32xf32, #tpu.memory_space<vmem>>, vector<2x8x32xf32>
    %1 = vector.shape_cast %0 : vector<2x8x32xf32> to vector<16x32xf32>
    %c0_2 = arith.constant 0 : index
    %c0_3 = arith.constant 0 : index
    %2 = vector.load %arg4[%c0_2, %c0_3] : memref<32x32xf32, #tpu.memory_space<vmem>>, vector<32x32xf32>
    %cst = arith.constant dense<0.000000e+00> : vector<16x32xf32>
    %3 = tpu.matmul %1, %2, %cst {dimension_numbers = #tpu.dot_dimension_numbers<[1], [0], [0], [1], [0, 0, 1, 1], [], []>} : vector<16x32xf32>, vector<32x32xf32>, vector<16x32xf32> -> vector<16x32xf32>
    %4 = vector.shape_cast %3 : vector<16x32xf32> to vector<2x8x32xf32>
    %c0_4 = arith.constant 0 : index
    %c0_5 = arith.constant 0 : index
    %5 = vector.load %arg2[%c0_4, %c0_5] : memref<2x32xf32, #tpu.memory_space<vmem>>, vector<2x32xf32>
    %c0_6 = arith.constant 0 : index
    %c0_7 = arith.constant 0 : index
    %6 = vector.load %arg5[%c0_6, %c0_7] : memref<32x32xf32, #tpu.memory_space<vmem>>, vector<32x32xf32>
    %cst_8 = arith.constant dense<0.000000e+00> : vector<2x32xf32>
    %7 = tpu.matmul %5, %6, %cst_8 {dimension_numbers = #tpu.dot_dimension_numbers<[1], [0], [0], [1], [0, 0, 1, 1], [], []>} : vector<2x32xf32>, vector<32x32xf32>, vector<2x32xf32> -> vector<2x32xf32>
    %8 = vector.shape_cast %7 : vector<2x32xf32> to vector<2x1x32xf32>
    %9 = vector.broadcast %8 : vector<2x1x32xf32> to vector<2x8x32xf32>
    %10 = arith.addf %4, %9 : vector<2x8x32xf32>
    %11 = math.tanh %10 : vector<2x8x32xf32>
    %c0_9 = arith.constant 0 : index
    %c0_10 = arith.constant 0 : index
    %12 = vector.load %arg6[%c0_9, %c0_10] : memref<1x32xf32, #tpu.memory_space<vmem>>, vector<1x32xf32>
    %13 = vector.shape_cast %12 : vector<1x32xf32> to vector<1x1x32xf32>
    %14 = vector.broadcast %13 : vector<1x1x32xf32> to vector<2x8x32xf32>
    %15 = arith.mulf %11, %14 : vector<2x8x32xf32>
    %cst_11 = arith.constant dense<0.000000e+00> : vector<2x8xf32>
    %16 = vector.multi_reduction <add>, %15, %cst_11 [2] : vector<2x8x32xf32> to vector<2x8xf32>
    %c0_12 = arith.constant 0 : index
    %c0_13 = arith.constant 0 : index
    %17 = vector.load %arg3[%c0_12, %c0_13] : memref<2x8xf32, #tpu.memory_space<vmem>>, vector<2x8xf32>
    %cst_14 = arith.constant 0.000000e+00 : f32
    %18 = vector.broadcast %cst_14 : f32 to vector<2x8xf32>
    %19 = arith.cmpf ogt, %17, %18 : vector<2x8xf32>
    %cst_15 = arith.constant -1.000000e+30 : f32
    %20 = vector.broadcast %cst_15 : f32 to vector<2x8xf32>
    %21 = arith.select %19, %16, %20 : vector<2x8xi1>, vector<2x8xf32>
    %cst_16 = arith.constant dense<0xFF800000> : vector<2xf32>
    %22 = vector.multi_reduction <maximumf>, %21, %cst_16 [1] : vector<2x8xf32> to vector<2xf32>
    %23 = vector.shape_cast %22 : vector<2xf32> to vector<2x1xf32>
    %24 = vector.broadcast %23 : vector<2x1xf32> to vector<2x8xf32>
    %25 = arith.subf %21, %24 : vector<2x8xf32>
    %26 = math.exp %25 : vector<2x8xf32>
    %cst_17 = arith.constant dense<0.000000e+00> : vector<2xf32>
    %27 = vector.multi_reduction <add>, %26, %cst_17 [1] : vector<2x8xf32> to vector<2xf32>
    %28 = vector.shape_cast %27 : vector<2xf32> to vector<2x1xf32>
    %29 = math.log %28 : vector<2x1xf32>
    %30 = arith.addf %29, %23 : vector<2x1xf32>
    %31 = vector.broadcast %30 : vector<2x1xf32> to vector<2x8xf32>
    %32 = arith.subf %21, %31 : vector<2x8xf32>
    %c0_18 = arith.constant 0 : index
    %c0_19 = arith.constant 0 : index
    %33 = vector.load %arg7[%c0_18, %c0_19] : memref<2x8xf32, #tpu.memory_space<vmem>>, vector<2x8xf32>
    tpu.vector_store %arg7[%c0_18, %c0_19], %32 {strides = array<i32>} : memref<2x8xf32, #tpu.memory_space<vmem>>, vector<2x8xf32>,
    return
  }
  func.func @transform_0(%arg0: i32) -> (i32, i32, i32) {
    %c0_i32 = arith.constant 0 : i32
    %c0_i32_0 = arith.constant 0 : i32
    %c0_i32_1 = arith.constant 0 : i32
    return %arg0, %c0_i32, %c0_i32_0 : i32, i32, i32
  }
  func.func @transform_1(%arg0: i32) -> (i32, i32) {
    %c0_i32 = arith.constant 0 : i32
    %c0_i32_0 = arith.constant 0 : i32
    return %arg0, %c0_i32 : i32, i32
  }
  func.func @transform_2(%arg0: i32) -> (i32, i32) {
    %c0_i32 = arith.constant 0 : i32
    %c0_i32_0 = arith.constant 0 : i32
    return %arg0, %c0_i32 : i32, i32
  }
  func.func @transform_3(%arg0: i32) -> (i32, i32) {
    %c0_i32 = arith.constant 0 : i32
    %c0_i32_0 = arith.constant 0 : i32
    %c0_i32_1 = arith.constant 0 : i32
    return %c0_i32, %c0_i32_0 : i32, i32
  }
  func.func @transform_4(%arg0: i32) -> (i32, i32) {
    %c0_i32 = arith.constant 0 : i32
    %c0_i32_0 = arith.constant 0 : i32
    %c0_i32_1 = arith.constant 0 : i32
    return %c0_i32, %c0_i32_0 : i32, i32
  }
  func.func @transform_5(%arg0: i32) -> (i32, i32) {
    %c0_i32 = arith.constant 0 : i32
    %c0_i32_0 = arith.constant 0 : i32
    %c0_i32_1 = arith.constant 0 : i32
    return %c0_i32, %c0_i32_0 : i32, i32
  }
  func.func @transform_6(%arg0: i32) -> (i32, i32) {
    %c0_i32 = arith.constant 0 : i32
    %c0_i32_0 = arith.constant 0 : i32
    return %arg0, %c0_i32 : i32, i32
  }
}

</mosaic_0001>

<bundles_post_ra>
// kernel: tpu_custom_call.1
= control target key start
LH: loop header
LB: loop body
LE: loop exit
PB: predicated region body
PF: predicated region fallthrough
CT: control target
= control target key end

     0   :  { %11 = vsyncpa [#allocation3], 0  ;;  %s582_s0 = inlined_call_operand.hbm [shape: f32[2,8,32], index: 0, kind: input, shape index: {}]   ;;  %s583_s1 = inlined_call_operand.hbm [shape: f32[2,32], index: 1, kind: input, shape index: {}]   ;;  %s584_s2 = inlined_call_operand.vmem [shape: f32[2,8], index: 2, kind: input, shape index: {}]   ;;  %s585_s3 = inlined_call_operand.hbm [shape: f32[32,32], index: 3, kind: input, shape index: {}]   ;;  %s586_s4 = inlined_call_operand.hbm [shape: f32[32,32], index: 4, kind: input, shape index: {}]   ;;  %s587_s5 = inlined_call_operand.vmem [shape: f32[1,32], index: 5, kind: input, shape index: {}]   ;;  %s588_s6 = inlined_call_operand.hbm [shape: f32[2,8], index: 6, kind: output, shape index: {}]  }
   0x1   :  { %12 = vsyncpa [#allocation6], 0 }
   0x2   :  { %13 = vsyncpa [#allocation9], 0 }
   0x3   :  { %14 = vsyncpa [#allocation4], 0  ;;  %s508_s21 = smov [#allocation5]   ;;  %s509_s23 = smov [#allocation2]  }
   0x4   :  { %s33_s22 = sshll.u32 %s508_s21, 4  ;;  %s20_s24 = sshll.u32 %s509_s23, 4  ;;  %s34_s22 = int_to_ptr.vmem [resolvable:$true] %s33_s22  ;;  %s21_s24 = int_to_ptr.vmem [resolvable:$true] %s20_s24 }
   0x5   :  { %s408_s25 = scalar_lea.vmem %s34_s22, 32  ;;  %p413_p1 = scmp.lt.s32.totalorder %s34_s22, %s34_s22 }
   0x6   :  { %p409_p0 = scmp.ne.s32.totalorder %s34_s22, %s408_s25  ;;  %p414_p2 = scmp.lt.s32.totalorder %s408_s25, %s408_s25 }
   0x8   :  { %p415_p3 = por %p414_p2, %p413_p1 }
   0xa   :  { %p416_p4 = pnand %p415_p3, %p409_p0 }
   0xc   :  { %419 = shalt.err (!%p416_p4)
}
   0xd   :  { %36 = dma.hbm_to_vmem [thread:$0]  %s583_s1, 32, %s34_s22, [#allocation6]  }
   0xe   :  { %s428_s28 = scalar_lea.vmem %s21_s24, 256  ;;  %p433_p6 = scmp.lt.s32.totalorder %s21_s24, %s21_s24 }
   0xf   :  { %p429_p5 = scmp.ne.s32.totalorder %s21_s24, %s428_s28  ;;  %p434_p7 = scmp.lt.s32.totalorder %s428_s28, %s428_s28 }
  0x11   :  { %p435_p8 = por %p434_p7, %p433_p6 }
  0x13   :  { %p436_p9 = pnand %p435_p8, %p429_p5 }
  0x15   :  { %439 = shalt.err (!%p436_p9)
}
  0x16   :  { %s510_s29 = smov 128   ;;  %s511_s30 = smov 8  }
  0x17   :  { %26 = dma.hbm_to_vmem [thread:$0]  %s582_s0, 256, %s21_s24, [#allocation3], %s510_s29, %s510_s29, %s511_s30  }
  0x18   :  { %s512_s9 = smov [#allocation7]   ;;  %s513_s11 = smov [#allocation8]  }
  0x19   :  { %s44_s10 = sshll.u32 %s512_s9, 4  ;;  %s56_s12 = sshll.u32 %s513_s11, 4  ;;  %s45_s10 = int_to_ptr.vmem [resolvable:$true] %s44_s10  ;;  %s57_s12 = int_to_ptr.vmem [resolvable:$true] %s56_s12 }
  0x1a   :  { %s448_s1 = scalar_lea.vmem %s45_s10, 512  ;;  %p453_p11 = scmp.lt.s32.totalorder %s45_s10, %s45_s10 }
  0x1b   :  { %p449_p10 = scmp.ne.s32.totalorder %s45_s10, %s448_s1  ;;  %p454_p12 = scmp.lt.s32.totalorder %s448_s1, %s448_s1 }
  0x1d   :  { %p455_p13 = por %p454_p12, %p453_p11 }
  0x1f   :  { %p456_p0 = pnand %p455_p13, %p449_p10 }
  0x21   :  { %459 = shalt.err (!%p456_p0)
}
  0x22   :  { %50 = dma.hbm_to_vmem [thread:$0]  %s585_s3, 512, %s45_s10, [#allocation6], %s510_s29, %s510_s29, %s511_s30  }
  0x23   :  { %s468_s15 = scalar_lea.vmem %s57_s12, 512  ;;  %p473_p2 = scmp.lt.s32.totalorder %s57_s12, %s57_s12 }
  0x24   :  { %p469_p1 = scmp.ne.s32.totalorder %s57_s12, %s468_s15  ;;  %p474_p3 = scmp.lt.s32.totalorder %s468_s15, %s468_s15 }
  0x26   :  { %p475_p4 = por %p474_p3, %p473_p2 }
  0x28   :  { %p476_p5 = pnand %p475_p4, %p469_p1 }
  0x2a   :  { %479 = shalt.err (!%p476_p5)
}
  0x2b   :  { %62 = dma.hbm_to_vmem [thread:$0]  %s586_s4, 512, %s57_s12, [#allocation9], %s510_s29, %s510_s29, %s511_s30  }
  0x2c   :  { %500 = dma.done.wait [#allocation3], 256  }
  0x2d   :  { %501 = vsyncadd [#allocation3], 4294967040 }
  0x2e   :  { %502 = dma.done.wait [#allocation6], 544  }
  0x2f   :  { %503 = vsyncadd [#allocation6], 4294966752 }
  0x30   :  { %504 = dma.done.wait [#allocation9], 512  }
  0x31   :  { %505 = vsyncadd [#allocation9], 4294966784  ;;  %v514_v0 = vmov 0.0   ;;  %vm515_vm0 = vmmov 0   ;;  %v169_v1 = vld [vmem:[#allocation8 + $0x18] sm:$0xff]  ;;  %v168_v3 = vld [vmem:[#allocation8 + $0x10] sm:$0xff]  ;;  %v247_v12 = vlaneseq }
  0x32   :  { %371 = vmatprep.subr.mxu1 %v514_v0  ;;  %379 = vmatprep.mubr.msk.f32.mxu1 %vm515_vm0, %v514_v0  ;;  %v82_v2 = vld [vmem:[#allocation7 + $0x18] sm:$0xff]  ;;  %v81_v4 = vld [vmem:[#allocation7 + $0x10] sm:$0xff]  ;;  %v167_v5 = vld [vmem:[#allocation8 + $0x8] sm:$0xff]  ;;  %vm83_vm1 = vcmask 261120   ;;  %v516_v16 = vmov 1966171168  }
  0x33   :  { %372 = vmatpush3.msra.mxu1 %v169_v1  ;;  %360 = vmatprep.subr.mxu0 %v82_v2  ;;  %v80_v6 = vld [vmem:[#allocation7 + $0x8] sm:$0xff]  ;;  %v166_v7 = vld [vmem:[#allocation8] sm:$0xff]  ;;  %v165_v9 = vld [vmem:[#allocation5] sm:$0x3]  ;;  %v248_v13 = vshrl.u32 %v247_v12, 7  ;;  %v300_v14 = vand.u32 127, %v247_v12  ;;  %v245_v17 = vunpack.c.l.s4 %v516_v16 }
  0x34   :  { %373 = vmatprep.subr.mxu1 %v514_v0  ;;  %361 = vmatpush3.msra.mxu0 %v82_v2  ;;  %v79_v8 = vld [vmem:[#allocation7] sm:$0xff]  ;;  %v77_v10 = vld [vmem:[#allocation2] sm:$0xff]  ;;  %v78_v11 = vld [vmem:[#allocation2 + $0x8] sm:$0xff]  ;;  %vm309_vm2 = vcmask 1041409   ;;  %vm313_vm4 = vcmask 58368  }
  0x35   :  { %374 = vmatpush3.msra.mxu1 %v168_v3  ;;  %362 = vmatprep.subr.mxu0 %v81_v4  ;;  %v303_v15 = vsub.s32 %v300_v14, %v248_v13  ;;  %v246_v18 = vunpack.c.0.s8 %v245_v17  ;;  %v268_v22 = vsub.s32 0, %v248_v13  ;;  %v348_v33 = vld [vmem:[%s587_s5] ss:$0 sm:$0xff] }
  0x36   :  { %375 = vmatprep.subr.mxu1 %v514_v0  ;;  %363 = vmatpush3.msra.mxu0 %v81_v4  ;;  %v295_v41 = vld [vmem:[%s584_s2] sm:$0x3]  ;;  %s517_s2 = smov [#allocation10]  }
  0x37   :  { %376 = vmatpush3.msra.mxu1 %v167_v5  ;;  %364 = vmatprep.subr.mxu0 %v80_v6  ;;  %v249_v19 = vsub.s32 %v246_v18, %v248_v13  ;;  %vm296_vm3 = vcmp.gt.f32.partialorder %v295_v41, 0.0  ;;  %s334_s5 = sshll.u32 %s517_s2, 4  ;;  %s335_s5 = int_to_ptr.vmem [resolvable:$true] %s334_s5 }
  0x38   :  { %377 = vmatprep.subr.mxu1 %v514_v0  ;;  %365 = vmatpush3.msra.mxu0 %v80_v6  ;;  %s480_s19 = scalar_lea.vmem %s335_s5, 32  ;;  %p485_p7 = scmp.lt.s32.totalorder %s335_s5, %s335_s5 }
  0x39   :  { %378 = vmatpush3.msra.mxu1 %v166_v7  ;;  %366 = vmatprep.subr.mxu0 %v79_v8  ;;  %p481_p6 = scmp.ne.s32.totalorder %s335_s5, %s480_s19  ;;  %p486_p8 = scmp.lt.s32.totalorder %s480_s19, %s480_s19 }
  0x3a   :  { %380 = vmatmul.mubr.msk.f32.vlgmr.msra.gmra.mxu1 %vm83_vm1, %v165_v9  ;;  %367 = vmatpush3.msra.mxu0 %v79_v8 }
  0x3b   :  { %368 = vmatprep.mubr.msk.f32.mxu0 %vm83_vm1, %v77_v10  ;;  %p487_p9 = por %p486_p8, %p485_p7 }
  0x3c   :  { %369 = vmatmul.mubr.msk.f32.vlgmr.msra.gmra.mxu0 %vm83_vm1, %v78_v11 }
  0x3d   :  { %p488_p10 = pnand %p487_p9, %p481_p6 }
  0xfa   :  { %v239_v20 = vpop.f32.mrf.mxu1 }
  0xfb   :  { %v250_v21 = vrot.slane %v239_v20, %v249_v19 }
  0xfc   :  { %v370_v23 = vpop.f32.mrf.mxu0  ;;  %v381_v24 = vpop.f32.mrf.mxu1 }
  0xfd   :  { %v251_v25 = vcombine.high %v250_v21, %v250_v21  ;;  %v258_v26 = vrot.slane %v250_v21, %v249_v19 }
  0xfe   :  { %v156_v29 = vpop.f32.mrf.mxu0 }
  0xff   :  { %v265_v27 = vrot.slane %v251_v25, %v249_v19  ;;  %v269_v28 = vrot.slane %v258_v26, %v268_v22 }
 0x101   :  { %v273_v30 = vrot.slane %v265_v27, %v268_v22  ;;  %v276_v31 = vadd.f32 %v269_v28, %v156_v29 }
 0x103   :  { %v277_v32 = vadd.f32 %v370_v23, %v273_v30  ;;  %392 = vtanh.f32 %v276_v31 }
 0x105   :  { %394 = vtanh.f32 %v277_v32 }
 0x110   :  { %v393_v34 = vpop.eup %392 }
 0x111   :  { %v287_v35 = vmul.f32 %v393_v34, %v348_v33 }
 0x112   :  { %v395_v36 = vpop.eup %394 }
 0x113   :  { %v289_v37 = vsel %vm83_vm1, %v287_v35, 0.0  ;;  %v288_v38 = vmul.f32 %v395_v36, %v348_v33 }
 0x114   :  { %290 = vadd.xlane.f32.xlu0 %v289_v37 }
 0x115   :  { %v292_v39 = vsel %vm83_vm1, %v288_v38, 0.0 }
 0x118   :  { %293 = vadd.xlane.f32.xlu0 %v292_v39 }
 0x19d   :  { %v291_v40 = vpop.xlane.xlu0 %290 }
 0x19e   :  { %v304_v43 = vrot.slane %v291_v40, %v303_v15 }
 0x1a1   :  { %v294_v42 = vpop.xlane.xlu0 %293 }
 0x1a2   :  { %v308_v44 = vrot.slane %v294_v42, %v303_v15 }
 0x1a4   :  { %v310_v45 = vsel %vm309_vm2, %v308_v44, %v304_v43 }
 0x1a5   :  { %v312_v46 = vsel %vm296_vm3, %v310_v45, -1e+30 }
 0x1a6   :  { %v314_v47 = vsel %vm313_vm4, %v312_v46, -inf }
 0x1a7   :  { %315 = vmax.xlane.f32.xlu1 %v314_v47 }
 0x230   :  { %v316_v48 = vpop.xlane.xlu1 %315 }
 0x231   :  { %v317_v49 = vsub.f32 %v312_v46, %v316_v48 }
 0x233   :  { %v318_v50 = vmul.f32 1.442695, %v317_v49 }
 0x235   :  { %396 = vpow2.f32 %v318_v50 }
 0x242   :  { %v397_v51 = vpop.eup %396 }
 0x243   :  { %v320_v52 = vsel %vm313_vm4, %v397_v51, 0.0 }
 0x244   :  { %321 = vadd.xlane.f32.xlu1 %v320_v52 }
 0x2cd   :  { %v322_v53 = vpop.xlane.xlu1 %321 }
 0x2ce   :  { %398 = vlog2.f32 %v322_v53 }
 0x2db   :  { %v399_v54 = vpop.eup %398 }
 0x2dc   :  { %v324_v55 = vmul.f32 0.6931472, %v399_v54 }
 0x2de   :  { %v325_v56 = vadd.f32 %v324_v55, %v316_v48 }
 0x2e0   :  { %v326_v57 = vsub.f32 %v312_v46, %v325_v56 }
 0x2e2   :  { %327 = vst.msk [vmem:[#allocation10] sm:$0x3] %vm313_vm4, %v326_v57 }
 0x2e3   :  { %491 = shalt.err (!%p488_p10)
}
 0x2e4   :  { %337 = dma.vmem_to_hbm [thread:$0]  %s335_s5, 32, %s588_s6, [#allocation4]  }
 0x2e5   :  { %506 = dma.done.wait [#allocation4], 32  }
 0x2e6   :  { %507 = vsyncadd [#allocation4], 4294967264 }
 0x2e7   :  { %341 = vsyncpa [#allocation3], 1 }
 0x2e8   :  { %342 = vsyncpa [#allocation6], 1 }
 0x2e9   :  { %343 = vsyncpa [#allocation9], 1 }
 0x2ea   :  { %344 = vsyncpa [#allocation4], 1 }

</bundles_post_ra>
